<compile_context>
chip_gen: v6e
topology: v6e:2x2x1
jax: 0.10.0
libtpu: 0.0.40
codegen_flags: <defaults>
</compile_context>

<pallas_src>
import functools
import math

import jax
import jax.numpy as jnp
from jax import lax
from jax.experimental import pallas as pl
from jax.experimental.pallas import tpu as pltpu

_EPS = 1e-12
_VMEM_TILE_BUDGET = 36 * 1024 * 1024   # double-buffered tile budget (safe on v5e/v6e/v7x)
_VMEM_LIMIT_BYTES = 48 * 1024 * 1024   # scoped VMEM limit handed to Mosaic


def _round_up(x, n):
    return (x + n - 1) // n * n


def _sublane_multiple(dtype):
    # Sub-32-bit dtypes pack along sublanes: native tiles are (8,128) f32,
    # (16,128) bf16, (32,128) int8/fp8.
    return {4: 8, 2: 16, 1: 32}.get(jnp.dtype(dtype).itemsize, 8)


def _tile_vmem_bytes(block_b, block_n, K, op_itemsize, out_itemsize):
    per_step = (block_b * K * op_itemsize           # x tile
                + K * block_n * op_itemsize         # W^T tile
                + block_b * block_n * out_itemsize  # output tile
                + block_b * 4 + block_n * 4 + block_b * 4)  # x_inv, w_inv, labels
    return 2 * per_step                             # double buffering


def _pick_block(dim_pad, unit, max_block, fits=lambda b: True):
    """Largest multiple of `unit` <= max_block that divides dim_pad and fits VMEM."""
    cand = max(min(max_block, dim_pad) // unit * unit, unit)
    for b in range(cand, unit - 1, -unit):
        if dim_pad % b == 0 and fits(b):
            return b
    return unit


def _arcmargin_kernel(x_ref, wt_ref, xinv_ref, winv_ref, lab_ref, o_ref, *,
                      s, cos_m, sin_m, th, mm, easy_margin, block_n):
    # Raw (un-normalized) matmul on the MXU; operands may be bf16, accumulate in f32.
    dots = jnp.dot(x_ref[...], wt_ref[...], preferred_element_type=jnp.float32)

    # cosine = (x . w) / (||x|| * ||w||): post-matmul inverse-norm scaling on (TB,TN).
    cosine = dots * xinv_ref[...] * winv_ref[...]           # (TB,1)*(1,TN) broadcast, f32

    # Clamp so a few ULP of |cosine| > 1 from rounding cannot produce NaN.
    sine = jnp.sqrt(jnp.maximum(1.0 - cosine * cosine, 0.0))
    phi = cosine * cos_m - sine * sin_m
    if easy_margin:
        phi = jnp.where(cosine > 0.0, phi, cosine)
    else:
        phi = jnp.where(cosine > th, phi, cosine - mm)

    # One-hot scatter via iota compare (offset by the N-tile index = outer grid axis);
    # fold in the s scale.
    col = lax.broadcasted_iota(jnp.int32, cosine.shape, 1) + pl.program_id(0) * block_n
    out = jnp.where(col == lab_ref[...], phi, cosine) * s
    o_ref[...] = out.astype(o_ref.dtype)


def prepare_arc_margin_weight(weight, *, operand_dtype=jnp.bfloat16):
    """One-time preprocessing of the ArcFace class-weight matrix.

    Returns (wt_op, w_inv):
      wt_op: W pre-transposed to (in_features, out_features) in `operand_dtype`, so the
             kernel matmul is a plain x @ W^T with out_features on the lane axis.
      w_inv: per-class inverse L2 norms, shape (1, out_features), f32.
    Compute this ONCE per weight update (e.g. jit it alongside the optimizer step) and
    reuse across forward calls — it is the only full HBM pass over W outside the kernel.
    """
    wf = weight.astype(jnp.float32)
    w_inv = (1.0 / jnp.maximum(jnp.sqrt(jnp.sum(wf * wf, axis=-1)), _EPS)).reshape(1, -1)
    wt_op = wf.T.astype(operand_dtype)
    return wt_op, w_inv


def arc_margin_product(x, label, wt_op, w_inv, *, s=30.0, m=0.5, easy_margin=False,
                       out_dtype=jnp.float32, block_b=None, block_n=None):
    """ArcFace margin head forward from prepared weights.

    x: (B, in_features), label: (B,) int, wt_op: (in_features, out_features) in the MXU
    operand dtype, w_inv: (1, out_features) f32. Returns (B, out_features) `out_dtype`.
    """
    B, K = x.shape
    K2, N = wt_op.shape
    assert K2 == K, "wt_op must be (in_features, out_features)"
    operand_dtype = wt_op.dtype
    op_itemsize = jnp.dtype(operand_dtype).itemsize
    out_itemsize = jnp.dtype(out_dtype).itemsize
    sub = _sublane_multiple(operand_dtype)

    # ---- tile sizes: prefer blocks that divide the (rounded) dims -> no pad/slice ----
    B_pad = _round_up(B, sub)
    N_pad = _round_up(N, 128)
    if block_b is None:
        block_b = _pick_block(B_pad, sub, 128)
    else:
        block_b = _round_up(block_b, sub)
        B_pad = _round_up(B, block_b)

    def _fits(bn):
        return _tile_vmem_bytes(block_b, bn, K, op_itemsize, out_itemsize) <= _VMEM_TILE_BUDGET

    if block_n is None:
        block_n = _pick_block(N_pad, 128, 2048, _fits)
    else:
        block_n = _round_up(block_n, 128)
        N_pad = _round_up(N, block_n)

    # ---- tiny one-pass precompute on x (fuses with the operand cast) -----------------
    xf = x.astype(jnp.float32)
    x_inv = 1.0 / jnp.maximum(jnp.sqrt(jnp.sum(xf * xf, axis=-1, keepdims=True)), _EPS)
    x_op = x.astype(operand_dtype)
    lab = label.reshape(B, 1).astype(jnp.int32)

    # Pad only when the tile sizes do not divide (avoided by the default block choice).
    if B_pad != B:
        x_op = jnp.pad(x_op, ((0, B_pad - B), (0, 0)))
        x_inv = jnp.pad(x_inv, ((0, B_pad - B), (0, 0)))
        lab = jnp.pad(lab, ((0, B_pad - B), (0, 0)), constant_values=-1)
    if N_pad != N:
        wt_op = jnp.pad(wt_op, ((0, 0), (0, N_pad - N)))
        w_inv = jnp.pad(w_inv, ((0, 0), (0, N_pad - N)))

    kernel = functools.partial(
        _arcmargin_kernel,
        s=float(s), cos_m=math.cos(m), sin_m=math.sin(m),
        th=math.cos(math.pi - m), mm=math.sin(math.pi - m) * m,
        easy_margin=bool(easy_margin), block_n=block_n)

    # Grid: N tiles OUTER, B tiles INNER.  The W^T block index depends only on the outer
    # axis, so Pallas skips the re-DMA while the inner batch axis varies and the full W
    # matrix is streamed from HBM exactly once per call.  Only the small x tile re-streams.
    grid = (N_pad // block_n, B_pad // block_b)

    cost = pl.CostEstimate(
        flops=2 * B_pad * N_pad * K,
        transcendentals=B_pad * N_pad,  # one sqrt per logit
        bytes_accessed=(B_pad * K + K * N_pad) * op_itemsize
                       + B_pad * N_pad * out_itemsize
                       + (B_pad + N_pad + B_pad) * 4)

    out = pl.pallas_call(
        kernel,
        out_shape=jax.ShapeDtypeStruct((B_pad, N_pad), out_dtype),
        grid_spec=pltpu.PrefetchScalarGridSpec(
            num_scalar_prefetch=0,
            grid=grid,
            in_specs=[
                pl.BlockSpec((block_b, K), lambda j, i: (i, 0)),   # x tile (inner axis)
                pl.BlockSpec((K, block_n), lambda j, i: (0, j)),   # W^T tile (held on inner)
                pl.BlockSpec((block_b, 1), lambda j, i: (i, 0)),   # 1/||x|| per row
                pl.BlockSpec((1, block_n), lambda j, i: (0, j)),   # 1/||w|| per class
                pl.BlockSpec((block_b, 1), lambda j, i: (i, 0)),   # labels
            ],
            out_specs=pl.BlockSpec((block_b, block_n), lambda j, i: (i, j)),
        ),
        compiler_params=pltpu.CompilerParams(
            dimension_semantics=("parallel", "parallel"),
            vmem_limit_bytes=_VMEM_LIMIT_BYTES),
        cost_estimate=cost,
    )(x_op, wt_op, x_inv, w_inv, lab)

    if B_pad != B or N_pad != N:
        out = out[:B, :N]
    return out


def arc_margin_product_from_weight(x, weight, label, *, s=30.0, m=0.5, easy_margin=False,
                                   operand_dtype=jnp.bfloat16, out_dtype=jnp.float32,
                                   block_b=None, block_n=None):
    """Convenience one-shot wrapper (for training, cache prepare_arc_margin_weight)."""
    wt_op, w_inv = prepare_arc_margin_weight(weight, operand_dtype=operand_dtype)
    return arc_margin_product(x, label, wt_op, w_inv, s=s, m=m, easy_margin=easy_margin,
                              out_dtype=out_dtype, block_b=block_b, block_n=block_n)


def _reference(x, weight, label, *, s=30.0, m=0.5, easy_margin=False):
    """Pure-JAX f32 reference matching the PyTorch forward (with the sqrt clamp)."""
    xn = x / jnp.maximum(jnp.linalg.norm(x, axis=-1, keepdims=True), _EPS)
    wn = weight / jnp.maximum(jnp.linalg.norm(weight, axis=-1, keepdims=True), _EPS)
    cosine = xn @ wn.T
    sine = jnp.sqrt(jnp.maximum(1.0 - cosine ** 2, 0.0))
    cos_m, sin_m = math.cos(m), math.sin(m)
    th, mm = math.cos(math.pi - m), math.sin(math.pi - m) * m
    phi = cosine * cos_m - sine * sin_m
    phi = jnp.where(cosine > 0, phi, cosine) if easy_margin else \
        jnp.where(cosine > th, phi, cosine - mm)
    one_hot = jax.nn.one_hot(label, weight.shape[0], dtype=jnp.float32)
    return (one_hot * phi + (1.0 - one_hot) * cosine) * s


if __name__ == "__main__":
    B = 16
    in_features = 128
    out_features = 384   # multiple of 128 lanes; exercises real lane/sublane tiling

    key = jax.random.PRNGKey(0)
    k_x, k_w, k_lab = jax.random.split(key, 3)

    x = jax.random.normal(k_x, (B, in_features), dtype=jnp.float32)

    # Deterministic Xavier-uniform init: U(-a, a), a = sqrt(6 / (fan_in + fan_out))
    bound = math.sqrt(6.0 / (in_features + out_features))
    weight = jax.random.uniform(
        k_w, (out_features, in_features), dtype=jnp.float32,
        minval=-bound, maxval=bound)

    label = jax.random.randint(k_lab, (B,), 0, out_features, dtype=jnp.int32)

    ref = _reference(x, weight, label, s=30.0, m=0.5, easy_margin=False)

    # 1) f32-operand path with small tiles so the flipped (N, B) grid is exercised:
    #    grid = (3, 2); the W^T tile is held across the inner batch axis.
    out = arc_margin_product_from_weight(
        x, weight, label, s=30.0, m=0.5, easy_margin=False,
        operand_dtype=jnp.float32, out_dtype=jnp.float32, block_b=8, block_n=128)
    out = jax.block_until_ready(out)
    assert out.shape == (B, out_features)
    assert jnp.allclose(out, ref, atol=2e-3, rtol=2e-3), "f32 kernel mismatch vs reference"

    # 2) production default: cached bf16 W^T / w_inv prepared once, default tiles
    #    (block_b=16, block_n=384 -> single-step grid, no pad/slice copies).
    wt_op, w_inv = prepare_arc_margin_weight(weight, operand_dtype=jnp.bfloat16)
    out_bf16 = jax.block_until_ready(
        arc_margin_product(x, label, wt_op, w_inv, s=30.0, m=0.5, easy_margin=False))
    assert out_bf16.shape == (B, out_features)
    assert bool(jnp.max(jnp.abs(out_bf16 - ref)) < 0.5), "bf16 kernel deviates too much"

    # 3) bf16 logits output (halves output writeback traffic for large batches).
    out_bf16_out = jax.block_until_ready(
        arc_margin_product(x, label, wt_op, w_inv, s=30.0, m=0.5, easy_margin=False,
                           out_dtype=jnp.bfloat16))
    assert out_bf16_out.shape == (B, out_features)
    assert out_bf16_out.dtype == jnp.bfloat16
    assert bool(jnp.max(jnp.abs(out_bf16_out.astype(jnp.float32) - ref)) < 1.0)

    print("KERNEL_OK")
</pallas_src>

<mosaic_0001>
module attributes {stable_mosaic.version = 11 : i64} {
  func.func @_arcmargin_kernel(%arg0: i32, %arg1: i32, %arg2: memref<8x128xf32, #tpu.memory_space<vmem>>, %arg3: memref<128x128xf32, #tpu.memory_space<vmem>>, %arg4: memref<8x1xf32, #tpu.memory_space<vmem>>, %arg5: memref<1x128xf32, #tpu.memory_space<vmem>>, %arg6: memref<8x1xi32, #tpu.memory_space<vmem>>, %arg7: memref<8x128xf32, #tpu.memory_space<vmem>>) attributes {dimension_semantics = [#tpu.dimension_semantics<parallel>, #tpu.dimension_semantics<parallel>], iteration_bounds = array<i64: 3, 2>, scalar_prefetch = 0 : i64, scratch_operands = 0 : i64, tpu.core_type = #tpu.core_type<tc>, window_params = [{transform_indices = @transform_0, window_bounds = array<i64: 8, 128>}, {transform_indices = @transform_1, window_bounds = array<i64: 128, 128>}, {transform_indices = @transform_2, window_bounds = array<i64: 8, 1>}, {transform_indices = @transform_3, window_bounds = array<i64: 1, 128>}, {transform_indices = @transform_4, window_bounds = array<i64: 8, 1>}, {transform_indices = @transform_5, window_bounds = array<i64: 8, 128>}]} {
    %c0 = arith.constant 0 : index
    %c0_0 = arith.constant 0 : index
    %0 = vector.load %arg2[%c0, %c0_0] : memref<8x128xf32, #tpu.memory_space<vmem>>, vector<8x128xf32>
    %c0_1 = arith.constant 0 : index
    %c0_2 = arith.constant 0 : index
    %1 = vector.load %arg3[%c0_1, %c0_2] : memref<128x128xf32, #tpu.memory_space<vmem>>, vector<128x128xf32>
    %cst = arith.constant dense<0.000000e+00> : vector<8x128xf32>
    %2 = tpu.matmul %0, %1, %cst {dimension_numbers = #tpu.dot_dimension_numbers<[1], [0], [0], [1], [0, 0, 1, 1], [], []>} : vector<8x128xf32>, vector<128x128xf32>, vector<8x128xf32> -> vector<8x128xf32>
    %c0_3 = arith.constant 0 : index
    %c0_4 = arith.constant 0 : index
    %3 = vector.load %arg4[%c0_3, %c0_4] : memref<8x1xf32, #tpu.memory_space<vmem>>, vector<8x1xf32>
    %4 = vector.broadcast %3 : vector<8x1xf32> to vector<8x128xf32>
    %5 = arith.mulf %2, %4 : vector<8x128xf32>
    %c0_5 = arith.constant 0 : index
    %c0_6 = arith.constant 0 : index
    %6 = vector.load %arg5[%c0_5, %c0_6] : memref<1x128xf32, #tpu.memory_space<vmem>>, vector<1x128xf32>
    %7 = vector.broadcast %6 : vector<1x128xf32> to vector<8x128xf32>
    %8 = arith.mulf %5, %7 : vector<8x128xf32>
    %9 = arith.mulf %8, %8 : vector<8x128xf32>
    %cst_7 = arith.constant 1.000000e+00 : f32
    %10 = vector.broadcast %cst_7 : f32 to vector<8x128xf32>
    %11 = arith.subf %10, %9 : vector<8x128xf32>
    %cst_8 = arith.constant 0.000000e+00 : f32
    %12 = vector.broadcast %cst_8 : f32 to vector<8x128xf32>
    %13 = arith.maximumf %11, %12 : vector<8x128xf32>
    %14 = math.sqrt %13 : vector<8x128xf32>
    %cst_9 = arith.constant 0.87758255 : f32
    %15 = vector.broadcast %cst_9 : f32 to vector<8x128xf32>
    %16 = arith.mulf %8, %15 : vector<8x128xf32>
    %cst_10 = arith.constant 0.47942555 : f32
    %17 = vector.broadcast %cst_10 : f32 to vector<8x128xf32>
    %18 = arith.mulf %14, %17 : vector<8x128xf32>
    %19 = arith.subf %16, %18 : vector<8x128xf32>
    %cst_11 = arith.constant -0.87758255 : f32
    %20 = vector.broadcast %cst_11 : f32 to vector<8x128xf32>
    %21 = arith.cmpf ogt, %8, %20 : vector<8x128xf32>
    %cst_12 = arith.constant 0.239712775 : f32
    %22 = vector.broadcast %cst_12 : f32 to vector<8x128xf32>
    %23 = arith.subf %8, %22 : vector<8x128xf32>
    %24 = arith.select %21, %19, %23 : vector<8x128xi1>, vector<8x128xf32>
    %25 = tpu.iota {dimensions = array<i32: 1>} : vector<8x128xi32>
    %c128_i32 = arith.constant 128 : i32
    %26 = arith.muli %arg0, %c128_i32 : i32
    %27 = vector.broadcast %26 : i32 to vector<8x128xi32>
    %28 = arith.addi %25, %27 : vector<8x128xi32>
    %c0_13 = arith.constant 0 : index
    %c0_14 = arith.constant 0 : index
    %29 = vector.load %arg6[%c0_13, %c0_14] : memref<8x1xi32, #tpu.memory_space<vmem>>, vector<8x1xi32>
    %30 = vector.broadcast %29 : vector<8x1xi32> to vector<8x128xi32>
    %31 = arith.cmpi eq, %28, %30 : vector<8x128xi32>
    %32 = arith.select %31, %24, %8 : vector<8x128xi1>, vector<8x128xf32>
    %cst_15 = arith.constant 3.000000e+01 : f32
    %33 = vector.broadcast %cst_15 : f32 to vector<8x128xf32>
    %34 = arith.mulf %32, %33 : vector<8x128xf32>
    %c0_16 = arith.constant 0 : index
    %c0_17 = arith.constant 0 : index
    %35 = vector.load %arg7[%c0_16, %c0_17] : memref<8x128xf32, #tpu.memory_space<vmem>>, vector<8x128xf32>
    tpu.vector_store %arg7[%c0_16, %c0_17], %34 {strides = array<i32>} : memref<8x128xf32, #tpu.memory_space<vmem>>, vector<8x128xf32>,
    return
  }
  func.func @transform_0(%arg0: i32, %arg1: i32) -> (i32, i32) {
    %c0_i32 = arith.constant 0 : i32
    %c0_i32_0 = arith.constant 0 : i32
    return %arg1, %c0_i32 : i32, i32
  }
  func.func @transform_1(%arg0: i32, %arg1: i32) -> (i32, i32) {
    %c0_i32 = arith.constant 0 : i32
    %c0_i32_0 = arith.constant 0 : i32
    return %c0_i32, %arg0 : i32, i32
  }
  func.func @transform_2(%arg0: i32, %arg1: i32) -> (i32, i32) {
    %c0_i32 = arith.constant 0 : i32
    %c0_i32_0 = arith.constant 0 : i32
    return %arg1, %c0_i32 : i32, i32
  }
  func.func @transform_3(%arg0: i32, %arg1: i32) -> (i32, i32) {
    %c0_i32 = arith.constant 0 : i32
    %c0_i32_0 = arith.constant 0 : i32
    return %c0_i32, %arg0 : i32, i32
  }
  func.func @transform_4(%arg0: i32, %arg1: i32) -> (i32, i32) {
    %c0_i32 = arith.constant 0 : i32
    %c0_i32_0 = arith.constant 0 : i32
    return %arg1, %c0_i32 : i32, i32
  }
  func.func @transform_5(%arg0: i32, %arg1: i32) -> (i32, i32) {
    %c0_i32 = arith.constant 0 : i32
    return %arg1, %arg0 : i32, i32
  }
}

</mosaic_0001>

<bundles_post_ra>
// kernel: tpu_custom_call.1
= control target key start
LH: loop header
LB: loop body
LE: loop exit
PB: predicated region body
PF: predicated region fallthrough
CT: control target
= control target key end

     0   :  { %s1187_s0 = inlined_call_operand.vmem [shape: f32[16,128], index: 0, kind: input, shape index: {}]   ;;  %s1188_s1 = inlined_call_operand.hbm [shape: f32[128,384], index: 1, kind: input, shape index: {}]   ;;  %s1189_s2 = inlined_call_operand.vmem [shape: f32[16,1], index: 2, kind: input, shape index: {}]   ;;  %s1190_s3 = inlined_call_operand.vmem [shape: f32[1,384], index: 3, kind: input, shape index: {}]   ;;  %s1191_s4 = inlined_call_operand.vmem [shape: s32[16,1], index: 4, kind: input, shape index: {}]   ;;  %s1192_s5 = inlined_call_operand.hbm [shape: f32[16,384], index: 5, kind: output, shape index: {}]  }
   0x1   :  { %1198 = sst [smem:[#allocation13_spill]] %s1192_s5 }
   0x2   :  { %10 = vsyncpa [#allocation3], 0 }
   0x3   :  { %12 = vsyncpa [#allocation3 + $0x1], 0 }
   0x4   :  { %13 = vsyncpa [#allocation4], 0 }
   0x5   :  { %15 = vsyncpa [#allocation4 + $0x1], 0  ;;  %s967_s18 = smov 0   ;;  %s969_s19 = smov 0  }
   0x6   :  { %s971_s20 = smov 0   ;;  %s973_s21 = smov 0  }
   0x7   :  { %s975_s22 = smov 0   ;;  %s977_s23 = smov 0  }
   0x8   :  { %s979_s24 = smov 0   ;;  %s981_s25 = smov 0  }
   0x9   :  { %s983_s26 = smov 0   ;;  %s985_s27 = smov 0  }
   0xa   :  { %s987_s28 = smov 0  }
   0xb LB: > { %1199 = sst [smem:[#allocation8_spill]] %s919_s26  ;;  %s596_s29 = sadd.s32 4294967295, %s927_s28   ;;  %s927_s28 = sphi %s987_s28, %s21_s28   ;;  %s923_s27 = sphi %s985_s27, %s1214_s27   ;;  %s919_s26 = sphi %s983_s26, %s1213_s26   ;;  %s915_s25 = sphi %s981_s25, %s1212_s25   ;;  %s911_s24 = sphi %s979_s24, %s1211_s24   ;;  %s907_s23 = sphi %s977_s23, %s1220_s23   ;;  %s903_s22 = sphi %s975_s22, %s1219_s22   ;;  %s899_s21 = sphi %s973_s21, %s1218_s21   ;;  %s895_s20 = sphi %s971_s20, %s1217_s20   ;;  %s891_s19 = sphi %s969_s19, %s1216_s19   ;;  %s887_s18 = sphi %s967_s18, %s1215_s18  }
   0xc   : > { %1200 = sst [smem:[#allocation9_spill]] %s923_s27  ;;  %s597_s30 = sadd.s32 4294967294, %s927_s28  }
   0xd   : > { %s30_s6 = sadd.s32 1, %s919_s26  ;;  %s33_s7 = sadd.s32 1, %s923_s27 }
   0xe   : > { %p31_p0 = scmp.ge.s32.totalorder %s30_s6, 2  ;;  %s66_s8 = sadd.s32 1, %s907_s23 }
   0xf   : > { %p73_p1 = scmp.ne.s32.totalorder %s907_s23, %s903_s22  ;;  %p74_p2 = scmp.eq.s32.totalorder %s927_s28, 0 }
  0x10   : > { %s1222_s6 = smov (%p31_p0, %s30_s6), 0  ;;  %s1224_s7 = smov (!%p31_p0, %s33_s7), %s923_s27 }
  0x11   : > { %1201 = sst [smem:[#allocation10_spill]] %s1222_s6  ;;  %p1031_p3 = por %p74_p2, %p73_p1 }
  0x12   : > { %p79_p4 = scmp.ne.s32.totalorder %s903_s22, %s899_s21  ;;  %p35_p5 = scmp.ge.s32.totalorder %s1224_s7, 3 }
  0x13   : > { %p80_p6 = scmp.eq.s32.totalorder %s596_s29, 0  ;;  %s167_s10 = ssub.s32 %s919_s26, %s1222_s6 }
  0x14   : > { %s172_s11 = sadd.s32 1, %s895_s20  ;;  %s1226_s7 = smov (%p35_p5, %s1224_s7), 0 }
  0x15   : > { %1203 = sst [smem:[#allocation11_spill]] %s1226_s7  ;;  %p1041_p7 = por %p80_p6, %p79_p4 }
  0x16   : > { %p182_p8 = scmp.ne.s32.totalorder %s895_s20, %s891_s19  ;;  %s63_s13 = ssub.s32 %s923_s27, %s1226_s7 }
  0x17   : > { %p183_p9 = scmp.eq.s32.totalorder %s596_s29, 5  ;;  %p64_p10 = scmp.eq.s32.totalorder %s63_s13, 0 }
  0x18   : > { %s169_s14 = sor.u32 %s167_s10, %s63_s13  ;;  %p188_p13 = scmp.ne.s32.totalorder %s891_s19, %s887_s18 }
  0x19   : > { %p170_p11 = scmp.eq.s32.totalorder %s169_s14, 0  ;;  %p1049_p12 = por %p183_p9, %p182_p8 }
  0x1a   : > { %s1054_s16 = scalar_select %p64_p10, %s907_s23, %s66_s8  }
  0x1b   : > { %s1057_s17 = scalar_select %p170_p11, %s895_s20, %s172_s11  }
  0x1c   : > { %1206 = sst [smem:[#allocation12_spill]] %s1054_s16  ;;  %p189_p0 = scmp.eq.s32.totalorder %s597_s30, 5 }
  0x1d   : > { %p680_p1 = scmp.lt.s32.totalorder %s927_s28, 6  ;;  %s216_s29 = sand.u32 1, %s907_s23  }
  0x1e   : > { %p1062_p2 = por %p189_p0, %p188_p13  ;;  %s600_s7 = sshll.u32 %s216_s29, 7 }
  0x1f   : > { %s601_s10 = sshll.u32 %s923_s27, 7  ;;  %s220_s26 = scalar_lea.vmem [#allocation2], %s600_s7 }
  0x20   : > { %s225_s6 = scalar_lea.hbm %s1188_s1, %s601_s10  ;;  %s226_s5 = sshll.u32 %s220_s26, 4  ;;  %s227_s5 = int_to_ptr.vmem [resolvable:$true] %s226_s5 }
  0x21   : > { %p1073_p4 = pnand %p680_p1, %p1031_p3  ;;  %s217_s30 = scalar_lea.sflag [#allocation3], %s216_s29 }
  0x22   : > { %s792_s11 = scalar_lea.vmem %s227_s5, 2048  ;;  %s929_s27 = smov [#allocation2]  }
  0x23   : > { %p781_p5 = pneg %p1073_p4  ;;  %p793_p6 = scmp.ne.s32.totalorder %s227_s5, %s792_s11 }
  0x24   : > { %s797_s16 = sshll.u32 %s929_s27, 4  ;;  %s798_s16 = int_to_ptr.vmem [resolvable:$false] %s797_s16 }
  0x25   : > { %p795_p8 = pnand %p793_p6, %p781_p5  ;;  %s799_s10 = scalar_lea.vmem %s798_s16, 4096 }
  0x26   : > { %p800_p10 = scmp.lt.s32.totalorder %s227_s5, %s798_s16  ;;  %p801_p11 = scmp.lt.s32.totalorder %s799_s10, %s792_s11 }
  0x27   : > { %p796_p9 = pneg %p795_p8 }
  0x28   : > { %p802_p13 = por %p801_p11, %p800_p10 }
  0x2a   : > { %p803_p0 = pnand %p802_p13, %p796_p9 }
  0x2c   : > { %806 = shalt.err (!%p803_p0)
}
  0x2d   : > { %s930_s26 = smov 384   ;;  %s931_s7 = smov 128  }
  0x2e   : > { %s932_s9 = smov 8   ;;  %p602_p3 = scmp.ge.s32.totalorder %s927_s28, 1 }
  0x2f   : > { %675 = dma.hbm_to_vmem [thread:$0]  (!%p1073_p4), %s225_s6, 2048, %s227_s5, %s217_s30, %s930_s26, %s931_s7, %s932_s9  }
  0x30   : > { %p254_p1 = scmp.lt.s32.totalorder %s927_s28, 7 }
  0x32   : > { %p255_p5 = pnand %p602_p3, %p254_p1 }
  0x33   : > { %s260_s27 = sand.u32 (!%p255_p5), 1, %s903_s22  }
  0x34   : > { %258 = sbr.rel (%p255_p5) target bundleno = 333 (0x14d), region = 40  ;;  %s603_s16 = sshll.u32 (!%p255_p5), %s260_s27, 7 }
  0x35   : > { %s261_s29 = scalar_lea.sflag (!%p255_p5), [#allocation3], %s260_s27  ;;  %s1084_s13 = scalar_lea.vmem (!%p255_p5), [#allocation2], %s603_s16 }
  0x39   : > { %878 = dma.done.wait (%p1041_p7), %s261_s29, 2048  }
  0x3a   : > { %880 = vsyncadd (%p1041_p7), %s261_s29, 4294965248  ;;  %p306_p4 = scmp.lt.s32.totalorder %s911_s24, 1  ;;  %v933_v0 = vmov 0.0   ;;  %vm934_vm0 = vmmov 0   ;;  %v935_v1 = vmov 0   ;;  %v337_v2 = vld [vmem:[%s1084_s13 + $0x78] sm:$0xff]  ;;  %v439_v30 = vlaneseq }
  0x3b   : > { %632 = vmatprep.subr.mxu0 %v933_v0  ;;  %664 = vmatprep.mubr.msk.f32.mxu0 %vm934_vm0, %v933_v0  ;;  %v336_v3 = vld [vmem:[%s1084_s13 + $0x70] sm:$0xff]  ;;  %v335_v4 = vld [vmem:[%s1084_s13 + $0x68] sm:$0xff]  ;;  %v334_v5 = vld [vmem:[%s1084_s13 + $0x60] sm:$0xff]  ;;  %p314_p7 = scmp.lt.s32.totalorder %s915_s25, 2  ;;  %s667_s12 = smul.u32 3, %s911_s24 }
  0x3c   : > { %776 = vset.pattern.permute.xlu0 %v935_v1  ;;  %s307_s5 = scalar_select %p306_p4, %s911_s24, 1  ;;  %633 = vmatpush3.msra.mxu0 %v337_v2  ;;  %v333_v7 = vld [vmem:[%s1084_s13 + $0x58] sm:$0xff]  ;;  %v332_v9 = vld [vmem:[%s1084_s13 + $0x50] sm:$0xff]  ;;  %v331_v10 = vld [vmem:[%s1084_s13 + $0x48] sm:$0xff]  ;;  %v440_v32 = vand.u32 127, %v439_v30 }
  0x3d   : > { %634 = vmatprep.subr.mxu0 %v933_v0  ;;  %v330_v11 = vld [vmem:[%s1084_s13 + $0x40] sm:$0xff]  ;;  %v329_v12 = vld [vmem:[%s1084_s13 + $0x38] sm:$0xff]  ;;  %v328_v13 = vld [vmem:[%s1084_s13 + $0x30] sm:$0xff]  ;;  %s315_s27 = scalar_select %p314_p7, %s915_s25, 2 }
  0x3e   : > { %s1094_s6 = sshll.u32 %s307_s5, 3  ;;  %635 = vmatpush3.msra.mxu0 %v336_v3  ;;  %v327_v14 = vld [vmem:[%s1084_s13 + $0x28] sm:$0xff]  ;;  %v326_v15 = vld [vmem:[%s1084_s13 + $0x20] sm:$0xff]  ;;  %v325_v16 = vld [vmem:[%s1084_s13 + $0x18] sm:$0xff]  ;;  %s1209_s7 = sld [smem:[#allocation13_spill]] }
  0x3f   : > { %s313_s8 = scalar_lea.vmem %s1189_s2, %s1094_s6  ;;  %636 = vmatprep.subr.mxu0 %v933_v0  ;;  %s320_s10 = scalar_lea.vmem %s1191_s4, %s1094_s6  ;;  %v324_v17 = vld [vmem:[%s1084_s13 + $0x10] sm:$0xff]  ;;  %v323_v18 = vld [vmem:[%s1084_s13 + $0x8] sm:$0xff]  ;;  %v322_v19 = vld [vmem:[%s1084_s13] sm:$0xff] }
  0x40   : > { %637 = vmatpush3.msra.mxu0 %v335_v4  ;;  %v408_v6 = vld [vmem:[%s313_s8] sm:$0xff]  ;;  %s309_s9 = scalar_lea.vmem %s1187_s0, %s1094_s6  ;;  %s316_s5 = scalar_lea.vmem %s1190_s3, %s315_s27 }
  0x41   : > { %638 = vmatprep.subr.mxu0 %v933_v0  ;;  %411 = vperm.xlu0 %776, %v408_v6   ;;  %v444_v8 = vld [vmem:[%s320_s10] sm:$0xff]  ;;  %s610_s13 = sshll.u32 %s915_s25, 7  ;;  %s303_s6 = sand.u32 1, %s891_s19  }
  0x42   : > { %639 = vmatpush3.msra.mxu0 %v334_v5  ;;  %v321_v20 = vld [vmem:[%s309_s9] sm:$0xff]  ;;  %v442_v34 = vstv %s610_s13  ;;  %s604_s14 = sshll.u32 %s303_s6, 3  ;;  %s464_s8 = sadd.s32 %s915_s25, %s667_s12 }
  0x43   : > { %640 = vmatprep.subr.mxu0 %v933_v0  ;;  %v608_v23 = vld [vmem:[%s316_s5] ss:$0 sm:$0xff]  ;;  %v443_v38 = vadd.s32 %v442_v34, %v440_v32  ;;  %s612_s30 = sshll.u32 %s464_s8, 7  ;;  %s305_s24 = scalar_lea.vmem [#allocation5], %s604_s14 }
  0x44   : > { %641 = vmatpush3.msra.mxu0 %v333_v7  ;;  %s468_s11 = sshll.u32 %s305_s24, 4  ;;  %s466_s9 = scalar_lea.hbm %s1209_s7, %s612_s30  ;;  %s469_s11 = int_to_ptr.vmem [resolvable:$true] %s468_s11 }
  0x45   : > { %642 = vmatprep.subr.mxu0 %v933_v0  ;;  %446 = vperm.xlu0 %776, %v444_v8   ;;  %s453_s25 = scalar_lea.sflag [#allocation4], %s303_s6  ;;  %s807_s27 = scalar_lea.vmem %s469_s11, 128 }
  0x46   : > { %643 = vmatpush3.msra.mxu0 %v332_v9  ;;  %p808_p6 = scmp.ne.s32.totalorder %s469_s11, %s807_s27  ;;  %s936_s16 = smov [#allocation5]  }
  0x47   : > { %644 = vmatprep.subr.mxu0 %v933_v0  ;;  %s811_s29 = sshll.u32 %s936_s16, 4  ;;  %s812_s29 = int_to_ptr.vmem [resolvable:$false] %s811_s29 }
  0x48   : > { %645 = vmatpush3.msra.mxu0 %v331_v10  ;;  %p809_p8 = pnand %p808_p6, %p1049_p12  ;;  %s813_s5 = scalar_lea.vmem %s812_s29, 256 }
  0x49   : > { %646 = vmatprep.subr.mxu0 %v933_v0  ;;  %p814_p10 = scmp.lt.s32.totalorder %s469_s11, %s812_s29  ;;  %p815_p11 = scmp.lt.s32.totalorder %s813_s5, %s807_s27 }
  0x4a   : > { %647 = vmatpush3.msra.mxu0 %v330_v11  ;;  %p810_p9 = pneg %p809_p8 }
  0x4b   : > { %648 = vmatprep.subr.mxu0 %v933_v0  ;;  %p816_p13 = por %p815_p11, %p814_p10 }
  0x4c   : > { %649 = vmatpush3.msra.mxu0 %v329_v12 }
  0x4d   : > { %650 = vmatprep.subr.mxu0 %v933_v0  ;;  %p817_p0 = pnand %p816_p13, %p810_p9 }
  0x4e   : > { %651 = vmatpush3.msra.mxu0 %v328_v13 }
  0x4f   : > { %652 = vmatprep.subr.mxu0 %v933_v0 }
  0x50   : > { %653 = vmatpush3.msra.mxu0 %v327_v14 }
  0x51   : > { %654 = vmatprep.subr.mxu0 %v933_v0 }
  0x52   : > { %655 = vmatpush3.msra.mxu0 %v326_v15 }
  0x53   : > { %656 = vmatprep.subr.mxu0 %v933_v0 }
  0x54   : > { %657 = vmatpush3.msra.mxu0 %v325_v16 }
  0x55   : > { %658 = vmatprep.subr.mxu0 %v933_v0 }
  0x56   : > { %659 = vmatpush3.msra.mxu0 %v324_v17 }
  0x57   : > { %660 = vmatprep.subr.mxu0 %v933_v0 }
  0x58   : > { %661 = vmatpush3.msra.mxu0 %v323_v18 }
  0x59   : > { %662 = vmatprep.subr.mxu0 %v933_v0 }
  0x5a   : > { %663 = vmatpush3.msra.mxu0 %v322_v19 }
  0x5b   : > { %665 = vmatmul.mubr.f32.vlgmr.msra.gmra.mxu0 %v321_v20 }
  0xbc   : > { %v412_v21 = vpop.permute.xlu0 %411 }
  0xc0   : > { %v447_v41 = vpop.permute.xlu0 %446 }
  0xc1   : > { %vm448_vm4 = vcmp.eq.s32.totalorder %v443_v38, %v447_v41 }
 0x11b   : > { %v404_v22 = vpop.f32.mrf.mxu0 }
 0x11c   : > { %v414_v24 = vmul.f32 %v412_v21, %v404_v22 }
 0x11d   : > { %v666_v25 = vpop.f32.mrf.mxu0 }
 0x11e   : > { %v422_v26 = vmul.f32 %v608_v23, %v414_v24 }
 0x120   : > { %v423_v27 = vmul.f32 %v422_v26, %v422_v26  ;;  %v433_v39 = vmul.f32 0.87758255, %v422_v26  ;;  %v609_v43 = vadd.f32 -0.23971277, %v422_v26  ;;  %vm436_vm3 = vcmp.gt.f32.partialorder %v422_v26, -0.87758255 }
 0x122   : > { %v424_v28 = vsub.f32 1.0, %v423_v27 }
 0x124   : > { %v425_v29 = vmax.f32 %v424_v28, 0.0 }
 0x126   : > { %777 = vrsqrt.f32 %v425_v29  ;;  %vm428_vm1 = vcmp.eq.f32.partialorder %v425_v29, inf  ;;  %v431_v35 = vand.u32 2147483648, %v425_v29  ;;  %vm430_vm2 = vcmp.eq.f32.partialorder %v425_v29, 0.0 }
 0x133   : > { %v778_v31 = vpop.eup %777 }
 0x134   : > { %v427_v33 = vmul.f32 %v778_v31, %v425_v29 }
 0x136   : > { %v429_v36 = vsel %vm428_vm1, %v425_v29, %v427_v33 }
 0x137   : > { %v432_v37 = vsel %vm430_vm2, %v431_v35, %v429_v36 }
 0x138   : > { %v434_v40 = vmul.f32 0.47942555, %v432_v37 }
 0x13a   : > { %v435_v42 = vsub.f32 %v433_v39, %v434_v40 }
 0x13c   : > { %v438_v44 = vsel %vm436_vm3, %v435_v42, %v609_v43 }
 0x13d   : > { %v449_v45 = vsel %vm448_vm4, %v438_v44, %v422_v26 }
 0x13e   : > { %v450_v46 = vmul.f32 30.0, %v449_v45 }
 0x140   : > { %451 = vst [vmem:[%s305_s24] sm:$0xff] %v450_v46 }
 0x141   : > { %820 = shalt.err (!%p817_p0)
}
 0x142   : > { %s821_s13 = scalar_lea.hbm %s466_s9, 128  ;;  %s825_s14 = scalar_lea.hbm %s1209_s7, 768 }
 0x143   : > { %p822_p3 = scmp.ne.s32.totalorder %s466_s9, %s821_s13  ;;  %p826_p4 = scmp.lt.s32.totalorder %s466_s9, %s1209_s7 }
 0x144   : > { %p827_p7 = scmp.lt.s32.totalorder %s825_s14, %s821_s13 }
 0x145   : > { %p823_p1 = pnand %p822_p3, %p1049_p12 }
 0x146   : > { %p828_p6 = por %p827_p7, %p826_p4 }
 0x147   : > { %p824_p5 = pneg %p823_p1 }
 0x149   : > { %p829_p8 = pnand %p828_p6, %p824_p5 }
 0x14b   : > { %832 = shalt.err (!%p829_p8)
}
 0x14c   : > { %670 = dma.vmem_to_hbm [thread:$0]  (%p1049_p12), %s469_s11, 128, %s466_s9, %s453_s25  }
 0x14d PF: > { %p681_p9 = scmp.ge.s32.totalorder %s927_s28, 2  ;;  %s480_s24 = sand.u32 1, %s887_s18  }
 0x14e   : > { %s481_s10 = scalar_lea.sflag [#allocation4], %s480_s24 }
 0x14f   : > { %p677_p10 = pnand %p681_p9, %p1062_p2 }
 0x151   : > { %p678_p11 = pneg %p677_p10 }
 0x153   : > { %882 = dma.done.wait (%p678_p11), %s481_s10, 128  }
 0x154   : > { %884 = vsyncadd (%p678_p11), %s481_s10, 4294967168  ;;  %s21_s28 = sadd.s32 1, %s927_s28   ;;  %s1210_s15 = sld [smem:[#allocation12_spill]] }
 0x155   : > { %p18_p13 = scmp.ge.s32.totalorder %s21_s28, 8   ;;  %s1211_s24 = sld [smem:[#allocation8_spill]] }
 0x156   : > { %s1212_s25 = sld [smem:[#allocation9_spill]]  ;;  %s1215_s18 = smov %s891_s19 }
 0x157   : > { %s1213_s26 = sld [smem:[#allocation10_spill]]  ;;  %s1216_s19 = smov %s895_s20 }
 0x158   : > { %s1214_s27 = sld [smem:[#allocation11_spill]]  ;;  %s1217_s20 = smov %s1057_s17 }
 0x159   : > { %s1218_s21 = smov %s903_s22  ;;  %s1219_s22 = smov %s907_s23 }
 0x15a   : > { %s1220_s23 = smov %s1210_s15  ;;  %20 = sbr.rel (!%p18_p13) target bundleno = 11 (0xb), region = 97 }
 0x15f   :  { %486 = vsyncpa [#allocation3], 1 }
 0x160   :  { %488 = vsyncpa [#allocation3 + $0x1], 1 }
 0x161   :  { %489 = vsyncpa [#allocation4], 1 }
 0x162   :  { %491 = vsyncpa [#allocation4 + $0x1], 1 }

</bundles_post_ra>
